<compile_context>
chip_gen: v6e
topology: v6e:2x2x1
jax: 0.10.0
libtpu: 0.0.40
codegen_flags: <defaults>
</compile_context>

<pallas_src>
import functools
import math

import jax
import jax.numpy as jnp
from jax.experimental import pallas as pl
from jax.experimental.pallas import tpu as pltpu


def _round_up(v, m):
    return ((v + m - 1) // m) * m


def _cbmcl_kernel(x_ref, gamma_ref, beta_ref, o_ref, *, nonlinearity, mxu_dtype):
    # x_ref block: (B_BLK, S, D_in) with S % 8 == 0 and D_in % 128 == 0.
    x = x_ref[...]
    # Max over the set dimension, per batch element / feature (stays f32).
    x_max = jnp.max(x, axis=1, keepdims=True)          # (B_BLK, 1, D_in)
    xc = x - x_max                                     # broadcast subtract (VPU)

    b_blk, s, d_in = x_ref.shape
    d_out = o_ref.shape[-1]

    # Collapse (B_BLK, S) -> rows: one big MXU matmul per grid step.
    # Layout-free because S is sublane-aligned and D_in is lane-aligned.
    lhs = xc.reshape(b_blk * s, d_in)
    rhs = gamma_ref[...]
    if mxu_dtype is not None:
        lhs = lhs.astype(mxu_dtype)
        rhs = rhs.astype(mxu_dtype)

    y = jnp.dot(lhs, rhs, preferred_element_type=jnp.float32)  # f32 accumulation
    y = y + beta_ref[...]                                      # (1, D_out) broadcast, f32

    if nonlinearity is not None:
        y = nonlinearity(y)

    o_ref[...] = y.reshape(b_blk, s, d_out).astype(o_ref.dtype)


def context_based_multichannel_linear(x, gamma, beta, nonlinearity=None,
                                      *, mxu_dtype="auto", b_blk=None):
    """x: (B, S, D_in), gamma: (D_in, D_out), beta: (D_out,) -> (B, S, D_out)."""
    B, S, D_in = x.shape
    D_in_g, D_out = gamma.shape
    if D_in != D_in_g:
        raise ValueError(f"gamma has input dim {D_in_g}, expected {D_in}")

    # Resolve the nonlinearity (raise on unknown strings instead of ignoring).
    if nonlinearity is None:
        nl = None
    elif callable(nonlinearity):
        nl = nonlinearity
    elif isinstance(nonlinearity, str):
        table = {
            "relu": lambda v: jnp.maximum(v, 0.0),
            "tanh": jnp.tanh,
            "sigmoid": jax.nn.sigmoid,
        }
        if nonlinearity not in table:
            raise ValueError(f"unsupported nonlinearity: {nonlinearity!r}")
        nl = table[nonlinearity]
    else:
        raise ValueError(f"unsupported nonlinearity: {nonlinearity!r}")

    # MXU operand dtype: bf16 operands + f32 accumulation is the fast path on
    # v5e/v6e/v7x; pass mxu_dtype=None for exact f32 operands.
    if mxu_dtype == "auto":
        mxu = jnp.bfloat16 if x.dtype == jnp.float32 else None
    else:
        mxu = mxu_dtype

    out_dtype = x.dtype
    itemsize = jnp.dtype(x.dtype).itemsize

    # ---- Pad to TPU-friendly tile shapes ------------------------------------
    S_p = _round_up(S, 8)          # sublane-aligned set dim (layout-free collapse)
    D_in_p = _round_up(D_in, 128)  # lane-aligned contraction dim
    D_out_p = _round_up(D_out, 128)  # lane-dense output -> unmasked vector stores

    x_p = x
    if S_p != S:
        # Edge-replicate along the set dim: per-batch max is unchanged and the
        # extra rows produce finite values that get sliced off below.
        x_p = jnp.pad(x_p, ((0, 0), (0, S_p - S), (0, 0)), mode="edge")
    if D_in_p != D_in:
        x_p = jnp.pad(x_p, ((0, 0), (0, 0), (0, D_in_p - D_in)))

    gamma_p = jnp.pad(gamma, ((0, D_in_p - D_in), (0, D_out_p - D_out)))
    if mxu is not None:
        gamma_p = gamma_p.astype(mxu)          # halves gamma's VMEM residency
    beta_p = jnp.pad(beta, (0, D_out_p - D_out)).reshape(1, D_out_p).astype(jnp.float32)

    # ---- Pick the batch tile -------------------------------------------------
    if b_blk is None:
        target_rows = 512                      # large M for MXU + HBM roofline
        b_blk = max(1, target_rows // S_p)
        # keep the x block <= ~4 MiB so double-buffering + intermediates fit VMEM
        max_rows = max(8, (4 << 20) // (itemsize * D_in_p))
        b_blk = min(b_blk, max(1, max_rows // S_p), B)
        # v7x has two TensorCores: prefer >=2 grid steps if M stays large enough.
        if b_blk == B and B > 1 and ((B // 2) * S_p) >= target_rows:
            b_blk = (B + 1) // 2
    b_blk = int(max(1, min(b_blk, B)))

    B_p = _round_up(B, b_blk)
    if B_p != B:
        x_p = jnp.pad(x_p, ((0, B_p - B), (0, 0), (0, 0)))
    grid = B_p // b_blk

    # ---- Cost estimate & VMEM budget ----------------------------------------
    flops = 2 * B_p * S_p * D_in_p * D_out_p + B_p * S_p * D_out_p
    bytes_accessed = (x_p.size * itemsize
                      + gamma_p.size * jnp.dtype(gamma_p.dtype).itemsize
                      + beta_p.size * 4
                      + B_p * S_p * D_out_p * itemsize)
    cost = pl.CostEstimate(flops=flops, transcendentals=0,
                           bytes_accessed=bytes_accessed)

    blk_rows = b_blk * S_p
    vmem_need = (2 * blk_rows * D_in_p * itemsize          # x double-buffer
                 + 2 * blk_rows * D_out_p * itemsize       # out double-buffer
                 + 4 * blk_rows * max(D_in_p, D_out_p) * 4   # in-kernel temporaries
                 + D_in_p * D_out_p * jnp.dtype(gamma_p.dtype).itemsize
                 + D_out_p * 4)
    vmem_limit = int(min(max(2 * vmem_need, 32 << 20), 56 << 20))

    kernel = functools.partial(_cbmcl_kernel, nonlinearity=nl, mxu_dtype=mxu)

    out_p = pl.pallas_call(
        kernel,
        out_shape=jax.ShapeDtypeStruct((B_p, S_p, D_out_p), out_dtype),
        grid_spec=pltpu.PrefetchScalarGridSpec(
            num_scalar_prefetch=0,
            grid=(grid,),
            in_specs=[
                pl.BlockSpec((b_blk, S_p, D_in_p), lambda b: (b, 0, 0)),   # x tile
                pl.BlockSpec((D_in_p, D_out_p), lambda b: (0, 0)),         # gamma (resident)
                pl.BlockSpec((1, D_out_p), lambda b: (0, 0)),              # beta (resident)
            ],
            out_specs=pl.BlockSpec((b_blk, S_p, D_out_p), lambda b: (b, 0, 0)),
        ),
        compiler_params=pltpu.CompilerParams(
            dimension_semantics=("parallel",),
            vmem_limit_bytes=vmem_limit,
        ),
        cost_estimate=cost,
    )(x_p, gamma_p, beta_p)

    # Slice away all padding (batch, set, output-dim).
    return out_p[:B, :S, :D_out]


def reference(x, gamma, beta, nonlinearity=None, mxu_dtype=None):
    x_max = jnp.max(x, axis=1, keepdims=True)
    xc = x - x_max
    if mxu_dtype is not None:
        y = jnp.matmul(xc.astype(mxu_dtype), gamma.astype(mxu_dtype),
                       preferred_element_type=jnp.float32)
    else:
        y = jnp.matmul(xc, gamma)
    y = beta + y
    if nonlinearity == "relu":
        y = jnp.maximum(y, 0.0)
    return y.astype(x.dtype)


if __name__ == "__main__":
    # Small shapes consistent with the module's forward.
    B, S = 2, 8            # batch, set_size
    D_in, D_out = 32, 32   # input_dim, output_dim

    key = jax.random.PRNGKey(0)
    kx, kg, kb = jax.random.split(key, 3)

    # Deterministic parameter init matching reset_weights():
    # uniform(-stdv, stdv) with stdv = 1/sqrt(output_dim)
    stdv = 1.0 / math.sqrt(D_out)
    gamma = jax.random.uniform(kg, (D_in, D_out), jnp.float32, -stdv, stdv)
    beta = jax.random.uniform(kb, (D_out,), jnp.float32, -stdv, stdv)
    x = jax.random.normal(kx, (B, S, D_in), jnp.float32)

    # Exact path (f32 MXU operands) against the f32 reference.
    out_f32 = context_based_multichannel_linear(x, gamma, beta,
                                                nonlinearity=None, mxu_dtype=None)
    out_f32 = jax.block_until_ready(out_f32)
    ref_f32 = reference(x, gamma, beta)
    assert out_f32.shape == (B, S, D_out)
    assert jnp.allclose(out_f32, ref_f32, atol=1e-5, rtol=1e-5)

    # Fast path (default): bf16 MXU operands + f32 accumulation, with ReLU.
    out_fast = context_based_multichannel_linear(x, gamma, beta, nonlinearity="relu")
    out_fast = jax.block_until_ready(out_fast)
    ref_fast = reference(x, gamma, beta, nonlinearity="relu", mxu_dtype=jnp.bfloat16)
    assert out_fast.shape == (B, S, D_out)
    assert jnp.allclose(out_fast, ref_fast, atol=1e-3, rtol=1e-3)

    print("KERNEL_OK")
</pallas_src>

<mosaic_0001>
module attributes {stable_mosaic.version = 11 : i64} {
  func.func @_cbmcl_kernel(%arg0: i32, %arg1: memref<2x8x128xf32, #tpu.memory_space<vmem>>, %arg2: memref<128x128xf32, #tpu.memory_space<vmem>>, %arg3: memref<1x128xf32, #tpu.memory_space<vmem>>, %arg4: memref<2x8x128xf32, #tpu.memory_space<vmem>>) attributes {dimension_semantics = [#tpu.dimension_semantics<parallel>], iteration_bounds = array<i64: 1>, scalar_prefetch = 0 : i64, scratch_operands = 0 : i64, tpu.core_type = #tpu.core_type<tc>, window_params = [{transform_indices = @transform_0, window_bounds = array<i64: 2, 8, 128>}, {pipeline_mode = #tpu.pipeline_mode<synchronous>, transform_indices = @transform_1, window_bounds = array<i64: 128, 128>}, {pipeline_mode = #tpu.pipeline_mode<synchronous>, transform_indices = @transform_2, window_bounds = array<i64: 1, 128>}, {transform_indices = @transform_3, window_bounds = array<i64: 2, 8, 128>}]} {
    %c0 = arith.constant 0 : index
    %c0_0 = arith.constant 0 : index
    %c0_1 = arith.constant 0 : index
    %0 = vector.load %arg1[%c0, %c0_0, %c0_1] : memref<2x8x128xf32, #tpu.memory_space<vmem>>, vector<2x8x128xf32>
    %cst = arith.constant dense<0xFF800000> : vector<2x128xf32>
    %1 = vector.multi_reduction <maximumf>, %0, %cst [1] : vector<2x8x128xf32> to vector<2x128xf32>
    %2 = vector.shape_cast %1 : vector<2x128xf32> to vector<2x1x128xf32>
    %3 = vector.broadcast %2 : vector<2x1x128xf32> to vector<2x8x128xf32>
    %4 = arith.subf %0, %3 : vector<2x8x128xf32>
    %5 = vector.shape_cast %4 : vector<2x8x128xf32> to vector<16x128xf32>
    %c0_2 = arith.constant 0 : index
    %c0_3 = arith.constant 0 : index
    %6 = vector.load %arg2[%c0_2, %c0_3] : memref<128x128xf32, #tpu.memory_space<vmem>>, vector<128x128xf32>
    %cst_4 = arith.constant dense<0.000000e+00> : vector<16x128xf32>
    %7 = tpu.matmul %5, %6, %cst_4 {dimension_numbers = #tpu.dot_dimension_numbers<[1], [0], [0], [1], [0, 0, 1, 1], [], []>} : vector<16x128xf32>, vector<128x128xf32>, vector<16x128xf32> -> vector<16x128xf32>
    %c0_5 = arith.constant 0 : index
    %c0_6 = arith.constant 0 : index
    %8 = vector.load %arg3[%c0_5, %c0_6] : memref<1x128xf32, #tpu.memory_space<vmem>>, vector<1x128xf32>
    %9 = vector.broadcast %8 : vector<1x128xf32> to vector<16x128xf32>
    %10 = arith.addf %7, %9 : vector<16x128xf32>
    %11 = vector.shape_cast %10 : vector<16x128xf32> to vector<2x8x128xf32>
    %c0_7 = arith.constant 0 : index
    %c0_8 = arith.constant 0 : index
    %c0_9 = arith.constant 0 : index
    %12 = vector.load %arg4[%c0_7, %c0_8, %c0_9] : memref<2x8x128xf32, #tpu.memory_space<vmem>>, vector<2x8x128xf32>
    tpu.vector_store %arg4[%c0_7, %c0_8, %c0_9], %11 {strides = array<i32>} : memref<2x8x128xf32, #tpu.memory_space<vmem>>, vector<2x8x128xf32>,
    return
  }
  func.func @transform_0(%arg0: i32) -> (i32, i32, i32) {
    %c0_i32 = arith.constant 0 : i32
    %c0_i32_0 = arith.constant 0 : i32
    %c0_i32_1 = arith.constant 0 : i32
    return %arg0, %c0_i32, %c0_i32_0 : i32, i32, i32
  }
  func.func @transform_1(%arg0: i32) -> (i32, i32) {
    %c0_i32 = arith.constant 0 : i32
    %c0_i32_0 = arith.constant 0 : i32
    %c0_i32_1 = arith.constant 0 : i32
    return %c0_i32, %c0_i32_0 : i32, i32
  }
  func.func @transform_2(%arg0: i32) -> (i32, i32) {
    %c0_i32 = arith.constant 0 : i32
    %c0_i32_0 = arith.constant 0 : i32
    %c0_i32_1 = arith.constant 0 : i32
    return %c0_i32, %c0_i32_0 : i32, i32
  }
  func.func @transform_3(%arg0: i32) -> (i32, i32, i32) {
    %c0_i32 = arith.constant 0 : i32
    %c0_i32_0 = arith.constant 0 : i32
    %c0_i32_1 = arith.constant 0 : i32
    return %arg0, %c0_i32, %c0_i32_0 : i32, i32, i32
  }
}

</mosaic_0001>

<bundles_post_ra>
// kernel: tpu_custom_call.1
= control target key start
LH: loop header
LB: loop body
LE: loop exit
PB: predicated region body
PF: predicated region fallthrough
CT: control target
= control target key end

     0   :  { %8 = vsyncpa [#allocation3], 0  ;;  %s348_s0 = inlined_call_operand.hbm [shape: f32[2,8,128], index: 0, kind: input, shape index: {}]   ;;  %s349_s1 = inlined_call_operand.hbm [shape: f32[128,128], index: 1, kind: input, shape index: {}]   ;;  %s350_s2 = inlined_call_operand.vmem [shape: f32[1,128], index: 2, kind: input, shape index: {}]   ;;  %s351_s3 = inlined_call_operand.hbm [shape: f32[2,8,128], index: 3, kind: output, shape index: {}]  }
   0x1   :  { %9 = vsyncpa [#allocation6], 0 }
   0x2   :  { %10 = vsyncpa [#allocation4], 0  ;;  %s302_s12 = smov [#allocation2]  }
   0x3   :  { %s16_s13 = sshll.u32 %s302_s12, 4  ;;  %s17_s13 = int_to_ptr.vmem [resolvable:$true] %s16_s13 }
   0x4   :  { %s244_s14 = scalar_lea.vmem %s17_s13, 256  ;;  %p249_p1 = scmp.lt.s32.totalorder %s17_s13, %s17_s13 }
   0x5   :  { %p245_p0 = scmp.ne.s32.totalorder %s17_s13, %s244_s14  ;;  %p250_p2 = scmp.lt.s32.totalorder %s244_s14, %s244_s14 }
   0x7   :  { %p251_p3 = por %p250_p2, %p249_p1 }
   0x9   :  { %p252_p4 = pnand %p251_p3, %p245_p0 }
   0xb   :  { %255 = shalt.err (!%p252_p4)
}
   0xc   :  { %s303_s15 = smov 128   ;;  %s304_s16 = smov 8  }
   0xd   :  { %22 = dma.hbm_to_vmem [thread:$0]  %s348_s0, 256, %s17_s13, [#allocation3], %s303_s15, %s303_s15, %s304_s16  }
   0xe   :  { %s305_s19 = smov [#allocation5]  }
   0xf   :  { %s28_s20 = sshll.u32 %s305_s19, 4  ;;  %s29_s20 = int_to_ptr.vmem [resolvable:$true] %s28_s20 }
  0x10   :  { %s264_s21 = scalar_lea.vmem %s29_s20, 2048  ;;  %p269_p6 = scmp.lt.s32.totalorder %s29_s20, %s29_s20 }
  0x11   :  { %p265_p5 = scmp.ne.s32.totalorder %s29_s20, %s264_s21  ;;  %p270_p7 = scmp.lt.s32.totalorder %s264_s21, %s264_s21 }
  0x13   :  { %p271_p8 = por %p270_p7, %p269_p6 }
  0x15   :  { %p272_p9 = pnand %p271_p8, %p265_p5 }
  0x17   :  { %275 = shalt.err (!%p272_p9)
}
  0x18   :  { %34 = dma.hbm_to_vmem [thread:$0]  %s349_s1, 2048, %s29_s20, [#allocation6], %s303_s15, %s303_s15, %s304_s16  }
  0x19   :  { %296 = dma.done.wait [#allocation3], 256  }
  0x1a   :  { %297 = vsyncadd [#allocation3], 4294967040 }
  0x1b   :  { %298 = dma.done.wait [#allocation6], 2048  }
  0x1c   :  { %299 = vsyncadd [#allocation6], 4294965248  ;;  %v74_v0 = vld [vmem:[#allocation5 + $0x78] sm:$0xff]  ;;  %v73_v1 = vld [vmem:[#allocation5 + $0x70] sm:$0xff]  ;;  %s306_s24 = smov [#allocation7]  }
  0x1d   :  { %196 = vmatprep.subr.mxu0 %v74_v0  ;;  %v72_v2 = vld [vmem:[#allocation5 + $0x68] sm:$0xff]  ;;  %v71_v3 = vld [vmem:[#allocation5 + $0x60] sm:$0xff]  ;;  %v43_v4 = vld [vmem:[#allocation2] sm:$0xff]  ;;  %s164_s25 = sshll.u32 %s306_s24, 4  ;;  %s165_s25 = int_to_ptr.vmem [resolvable:$true] %s164_s25 }
  0x1e   :  { %197 = vmatpush3.msra.mxu0 %v74_v0  ;;  %v44_v5 = vld [vmem:[#allocation2 + $0x8] sm:$0xff]  ;;  %v45_v7 = vrot.slane %v43_v4, 4  ;;  %v69_v9 = vld [vmem:[#allocation5 + $0x50] sm:$0xff]  ;;  %v68_v12 = vld [vmem:[#allocation5 + $0x48] sm:$0xff]  ;;  %s276_s26 = scalar_lea.vmem %s165_s25, 256  ;;  %p281_p11 = scmp.lt.s32.totalorder %s165_s25, %s165_s25 }
  0x1f   :  { %198 = vmatprep.subr.mxu0 %v73_v1  ;;  %v70_v6 = vld [vmem:[#allocation5 + $0x58] sm:$0xff]  ;;  %v51_v8 = vrot.slane %v44_v5, 4  ;;  %v67_v14 = vld [vmem:[#allocation5 + $0x40] sm:$0xff]  ;;  %v65_v19 = vld [vmem:[#allocation5 + $0x30] sm:$0xff]  ;;  %p277_p10 = scmp.ne.s32.totalorder %s165_s25, %s276_s26  ;;  %p282_p12 = scmp.lt.s32.totalorder %s276_s26, %s276_s26 }
  0x20   :  { %199 = vmatpush3.msra.mxu0 %v73_v1  ;;  %v46_v10 = vmax.f32 %v43_v4, %v45_v7  ;;  %v66_v17 = vld [vmem:[#allocation5 + $0x38] sm:$0xff]  ;;  %v64_v22 = vld [vmem:[#allocation5 + $0x28] sm:$0xff]  ;;  %v63_v24 = vld [vmem:[#allocation5 + $0x20] sm:$0xff] }
  0x21   :  { %200 = vmatprep.subr.mxu0 %v72_v2  ;;  %v52_v11 = vmax.f32 %v44_v5, %v51_v8  ;;  %v62_v26 = vld [vmem:[#allocation5 + $0x18] sm:$0xff]  ;;  %v61_v27 = vld [vmem:[#allocation5 + $0x10] sm:$0xff]  ;;  %v60_v29 = vld [vmem:[#allocation5 + $0x8] sm:$0xff]  ;;  %p283_p13 = por %p282_p12, %p281_p11 }
  0x22   :  { %201 = vmatpush3.msra.mxu0 %v72_v2  ;;  %v47_v13 = vrot.slane %v46_v10, 2  ;;  %v59_v30 = vld [vmem:[#allocation5] sm:$0xff]  ;;  %v177_v32 = vld [vmem:[%s350_s2] ss:$0 sm:$0xff] }
  0x23   :  { %202 = vmatprep.subr.mxu0 %v71_v3  ;;  %v53_v16 = vrot.slane %v52_v11, 2  ;;  %p284_p0 = pnand %p283_p13, %p277_p10 }
  0x24   :  { %203 = vmatpush3.msra.mxu0 %v71_v3  ;;  %v48_v15 = vmax.f32 %v46_v10, %v47_v13 }
  0x25   :  { %204 = vmatprep.subr.mxu0 %v70_v6  ;;  %v54_v21 = vmax.f32 %v52_v11, %v53_v16 }
  0x26   :  { %205 = vmatpush3.msra.mxu0 %v70_v6  ;;  %v49_v18 = vrot.slane %v48_v15, 1 }
  0x27   :  { %206 = vmatprep.subr.mxu0 %v69_v9  ;;  %v55_v25 = vrot.slane %v54_v21, 1 }
  0x28   :  { %207 = vmatpush3.msra.mxu0 %v69_v9  ;;  %v50_v20 = vmax.f32 %v48_v15, %v49_v18 }
  0x29   :  { %208 = vmatprep.subr.mxu0 %v68_v12  ;;  %v56_v28 = vmax.f32 %v54_v21, %v55_v25 }
  0x2a   :  { %209 = vmatpush3.msra.mxu0 %v68_v12  ;;  %v57_v23 = vsub.f32 %v43_v4, %v50_v20 }
  0x2b   :  { %210 = vmatprep.subr.mxu0 %v67_v14  ;;  %v58_v31 = vsub.f32 %v44_v5, %v56_v28 }
  0x2c   :  { %211 = vmatpush3.msra.mxu0 %v67_v14  ;;  %228 = vmatprep.mubr.f32.mxu0 %v57_v23 }
  0x2d   :  { %212 = vmatprep.subr.mxu0 %v66_v17 }
  0x2e   :  { %213 = vmatpush3.msra.mxu0 %v66_v17 }
  0x2f   :  { %214 = vmatprep.subr.mxu0 %v65_v19 }
  0x30   :  { %215 = vmatpush3.msra.mxu0 %v65_v19 }
  0x31   :  { %216 = vmatprep.subr.mxu0 %v64_v22 }
  0x32   :  { %217 = vmatpush3.msra.mxu0 %v64_v22 }
  0x33   :  { %218 = vmatprep.subr.mxu0 %v63_v24 }
  0x34   :  { %219 = vmatpush3.msra.mxu0 %v63_v24 }
  0x35   :  { %220 = vmatprep.subr.mxu0 %v62_v26 }
  0x36   :  { %221 = vmatpush3.msra.mxu0 %v62_v26 }
  0x37   :  { %222 = vmatprep.subr.mxu0 %v61_v27 }
  0x38   :  { %223 = vmatpush3.msra.mxu0 %v61_v27 }
  0x39   :  { %224 = vmatprep.subr.mxu0 %v60_v29 }
  0x3a   :  { %225 = vmatpush3.msra.mxu0 %v60_v29 }
  0x3b   :  { %226 = vmatprep.subr.mxu0 %v59_v30 }
  0x3c   :  { %227 = vmatpush3.msra.mxu0 %v59_v30 }
  0x3d   :  { %229 = vmatmul.mubr.f32.vlgmr.msra.gmra.mxu0 %v58_v31 }
  0xfd   :  { %v230_v33 = vpop.f32.mrf.mxu0 }
  0xfe   :  { %v154_v34 = vadd.f32 %v230_v33, %v177_v32 }
  0xff   :  { %v148_v35 = vpop.f32.mrf.mxu0 }
 0x100   :  { %158 = vst [vmem:[#allocation7 + $0x8] sm:$0xff] %v154_v34  ;;  %v149_v36 = vadd.f32 %v177_v32, %v148_v35 }
 0x102   :  { %157 = vst [vmem:[#allocation7] sm:$0xff] %v149_v36 }
 0x103   :  { %287 = shalt.err (!%p284_p0)
}
 0x104   :  { %170 = dma.vmem_to_hbm [thread:$0]  %s165_s25, 256, %s351_s3, [#allocation4], %s303_s15, %s303_s15, %s304_s16  }
 0x105   :  { %300 = dma.done.wait [#allocation4], 256  }
 0x106   :  { %301 = vsyncadd [#allocation4], 4294967040 }
 0x107   :  { %174 = vsyncpa [#allocation3], 1 }
 0x108   :  { %175 = vsyncpa [#allocation6], 1 }
 0x109   :  { %176 = vsyncpa [#allocation4], 1 }

</bundles_post_ra>
